<compile_context>
chip_gen: v7x
topology: tpu7x:2x2x1
jax: 0.10.0
libtpu: 0.0.40
codegen_flags: <defaults>
</compile_context>

<pallas_src>
import functools

import jax
import jax.numpy as jnp
from jax.experimental import pallas as pl
from jax.experimental.pallas import tpu as pltpu


# ---------------------------------------------------------------------------
# kv projection kernel: kv = context @ Wkv, split into k, v (once per batch).
# ---------------------------------------------------------------------------
def kv_projection_kernel(ctx_ref, wkv_ref, k_ref, v_ref, *, dim_head):
    kv = jnp.dot(ctx_ref[0], wkv_ref[...], preferred_element_type=jnp.float32)
    k_ref[0] = kv[:, :dim_head].astype(k_ref.dtype)
    v_ref[0] = kv[:, dim_head:].astype(v_ref.dtype)


# ---------------------------------------------------------------------------
# cross-attention kernel: LayerNorm + q proj + flash attention + out proj.
# ---------------------------------------------------------------------------
def cross_attention_kernel(
    x_ref,      # (1, block_n, DIM)   input dtype (f32)
    k_ref,      # (1, block_m, DH)    compute dtype
    v_ref,      # (1, block_m, DH)    compute dtype
    gamma_ref,  # (1, DIM)            f32 LayerNorm weight
    beta_ref,   # (1, DIM)            f32 LayerNorm bias
    wq_ref,     # (DIM, H*DH)         compute dtype, softmax scale pre-folded
    wout_ref,   # (H*DH, DIM)         compute dtype
    o_ref,      # (1, block_n, DIM)
    q_scr,      # (H*block_n, DH)     compute dtype, persistent across m steps
    m_scr,      # (H*block_n, 1)      f32 running max
    l_scr,      # (H*block_n, 1)      f32 running sum
    acc_scr,    # (H*block_n, DH)     f32 running numerator
    *,
    heads,
    dim_head,
    eps,
    compute_dtype,
    exp_in_bf16,
):
    bn = x_ref.shape[1]
    m_idx = pl.program_id(2)
    m_last = pl.num_programs(2) - 1

    # ---- per-(b, n) init: LayerNorm + fused q projection + stats reset ----
    @pl.when(m_idx == 0)
    def _init():
        x = x_ref[0].astype(jnp.float32)                           # (bn, DIM)
        mean = jnp.mean(x, axis=-1, keepdims=True)
        xc = x - mean
        var = jnp.mean(xc * xc, axis=-1, keepdims=True)
        xn = xc * jax.lax.rsqrt(var + eps)
        xn = xn * gamma_ref[...] + beta_ref[...]                   # f32
        # one full-width q projection (scale already folded into wq)
        q_flat = jnp.dot(xn.astype(compute_dtype), wq_ref[...],
                         preferred_element_type=jnp.float32)       # (bn, H*DH)
        q_flat = q_flat.astype(compute_dtype)
        # lane-packed heads -> sublane-stacked heads via static aligned slices
        for h in range(heads):
            q_scr[h * bn:(h + 1) * bn, :] = (
                q_flat[:, h * dim_head:(h + 1) * dim_head])
        m_scr[...] = jnp.full(m_scr.shape, -jnp.inf, jnp.float32)
        l_scr[...] = jnp.zeros(l_scr.shape, jnp.float32)
        acc_scr[...] = jnp.zeros(acc_scr.shape, jnp.float32)

    # ---- online softmax over this context block (heads batched on sublanes,
    #      k/v are shared across heads so one matmul covers all heads) ----
    k = k_ref[0]                                                   # (bm, DH)
    v = v_ref[0]
    sim = jax.lax.dot_general(q_scr[...], k, (((1,), (1,)), ((), ())),
                              preferred_element_type=jnp.float32)  # (H*bn, bm)
    m_prev = m_scr[...]
    m_new = jnp.maximum(m_prev, jnp.max(sim, axis=-1, keepdims=True))
    alpha = jnp.exp(m_prev - m_new)
    shifted = sim - m_new
    if exp_in_bf16:
        # v6e/v7x: bf16 EUP runs ~2x the f32 rate; row sums stay in f32.
        p = jnp.exp(shifted.astype(jnp.bfloat16))
        p_sum = jnp.sum(p.astype(jnp.float32), axis=-1, keepdims=True)
    else:
        p = jnp.exp(shifted)
        p_sum = jnp.sum(p, axis=-1, keepdims=True)
    pv = jnp.dot(p.astype(compute_dtype), v,
                 preferred_element_type=jnp.float32)               # (H*bn, DH)
    l_scr[...] = alpha * l_scr[...] + p_sum
    acc_scr[...] = alpha * acc_scr[...] + pv
    m_scr[...] = m_new

    # ---- finalize: normalize, fused output projection, store ----
    @pl.when(m_idx == m_last)
    def _finalize():
        inv_l = pl.reciprocal(l_scr[...], approx=True)             # (H*bn, 1)
        o_stack = acc_scr[...] * inv_l                             # (H*bn, DH)
        # sublane-stacked heads -> lane-packed (bn, H*DH): aligned slices + one concat
        o_cat = jnp.concatenate(
            [o_stack[h * bn:(h + 1) * bn, :] for h in range(heads)], axis=1)
        out = jnp.dot(o_cat.astype(compute_dtype), wout_ref[...],
                      preferred_element_type=jnp.float32)          # (bn, DIM)
        o_ref[0] = out.astype(o_ref.dtype)


# ---------------------------------------------------------------------------
# Tiling helpers (VMEM-aware).
# ---------------------------------------------------------------------------
def _vmem_capacity_bytes():
    try:
        info = pltpu.get_tpu_info()
        cap = getattr(info, "vmem_capacity_bytes", None)
        if cap:
            return int(cap)
    except Exception:
        pass
    return 64 * 1024 * 1024   # conservative default (v7x per-TC VMEM)


def _divisor_block(total, candidates):
    for c in candidates:
        if c <= total and total % c == 0:
            return c
    return total


def _attn_vmem_bytes(block_n, block_m, dim, heads, dim_head, csize, xsize,
                     osize, single_buffer_weights):
    inner = heads * dim_head
    wbuf = 1 if single_buffer_weights else 2
    weights = wbuf * 2 * dim * inner * csize + 2 * 2 * dim * 4
    kv_tiles = 2 * 2 * block_m * dim_head * csize            # k + v, dbl-buffered
    xio_tiles = 2 * block_n * dim * (xsize + osize)          # x + out, dbl-buffered
    scratch = heads * block_n * (dim_head * (csize + 4) + 8)  # q, acc, m, l
    live = (3 * heads * block_n * block_m * 4                # sim / p / slack
            + 3 * block_n * dim * 4                          # xn / out f32 temps
            + 2 * block_n * inner * 4)                       # q_flat / o_cat temps
    return weights + kv_tiles + xio_tiles + scratch + live


def _pick_blocks(n, m, dim, heads, dim_head, csize, xsize, osize,
                 vmem_budget, single_buffer_weights):
    block_m = _divisor_block(m, (512, 256, 128, 64, 32, 16, 8))
    n_cands = [c for c in (1024, 512, 256, 128, 64, 32, 16)
               if c <= n and n % c == 0]          # multiples of 16 -> aligned slices
    if not n_cands:
        n_cands = [n]
    block_n = n_cands[-1]
    for c in n_cands:                              # largest first
        if _attn_vmem_bytes(c, block_m, dim, heads, dim_head, csize, xsize,
                            osize, single_buffer_weights) <= vmem_budget:
            block_n = c
            break
    return block_n, block_m


# ---------------------------------------------------------------------------
# Wrappers.
# ---------------------------------------------------------------------------
def _project_kv(context, wkv, dim_head, compute_dtype, block_m):
    B, M, CDIM = context.shape
    ctx = context.astype(compute_dtype)
    wkv_c = wkv.astype(compute_dtype)
    csize = jnp.dtype(compute_dtype).itemsize
    cost = pl.CostEstimate(
        flops=int(2 * B * M * CDIM * 2 * dim_head),
        transcendentals=0,
        bytes_accessed=int(ctx.size * csize + wkv_c.size * csize
                           + 2 * B * M * dim_head * csize),
    )
    return pl.pallas_call(
        functools.partial(kv_projection_kernel, dim_head=dim_head),
        out_shape=(jax.ShapeDtypeStruct((B, M, dim_head), compute_dtype),
                   jax.ShapeDtypeStruct((B, M, dim_head), compute_dtype)),
        grid_spec=pltpu.PrefetchScalarGridSpec(
            num_scalar_prefetch=0,
            grid=(B, M // block_m),
            in_specs=[
                pl.BlockSpec((1, block_m, CDIM), lambda b, m: (b, m, 0)),
                pl.BlockSpec((CDIM, 2 * dim_head), lambda b, m: (0, 0)),
            ],
            out_specs=[
                pl.BlockSpec((1, block_m, dim_head), lambda b, m: (b, m, 0)),
                pl.BlockSpec((1, block_m, dim_head), lambda b, m: (b, m, 0)),
            ],
        ),
        compiler_params=pltpu.CompilerParams(
            dimension_semantics=("parallel", "parallel")),
        cost_estimate=cost,
    )(ctx, wkv_c)


def cross_attention(x, context, params, *, heads, dim_head, eps=1e-5,
                    compute_dtype=jnp.bfloat16, out_dtype=None,
                    exp_in_bf16=False):
    B, N, DIM = x.shape
    _, M, CDIM = context.shape
    inner = heads * dim_head
    scale = dim_head ** -0.5
    out_dtype = x.dtype if out_dtype is None else out_dtype

    gamma, beta, wq, wkv, wout = params

    # One-time weight preparation (outside the kernel).
    gamma2 = gamma.reshape(1, DIM).astype(jnp.float32)
    beta2 = beta.reshape(1, DIM).astype(jnp.float32)
    wq_flat = (wq * scale).astype(compute_dtype)        # (DIM, H*DH), scale folded
    wout_flat = wout.astype(compute_dtype)              # (H*DH, DIM)

    csize = jnp.dtype(compute_dtype).itemsize
    xsize = jnp.dtype(x.dtype).itemsize
    osize = jnp.dtype(out_dtype).itemsize

    vmem_cap = _vmem_capacity_bytes()
    vmem_limit = min(int(vmem_cap * 3 // 4), 96 * 1024 * 1024)

    def _run(single_buffer_weights):
        block_n, block_m = _pick_blocks(
            N, M, DIM, heads, dim_head, csize, xsize, osize,
            vmem_budget=vmem_limit - (2 << 20),
            single_buffer_weights=single_buffer_weights)
        n_blocks = N // block_n
        m_blocks = M // block_m

        # k/v computed once per batch element (never recomputed per n block).
        k, v = _project_kv(context, wkv, dim_head, compute_dtype, block_m)

        if single_buffer_weights and hasattr(pl, "Buffered"):
            def const_spec(shape, index_map):
                return pl.BlockSpec(shape, index_map, pipeline_mode=pl.Buffered(1))
        else:
            def const_spec(shape, index_map):
                return pl.BlockSpec(shape, index_map)

        cost = pl.CostEstimate(
            flops=int(2 * B * (N * DIM * inner
                               + 2 * heads * N * M * dim_head
                               + N * inner * DIM)),
            transcendentals=int(B * heads * N * M),
            bytes_accessed=int(B * N * DIM * (xsize + osize)
                               + 2 * B * M * dim_head * csize * n_blocks
                               + 2 * DIM * inner * csize
                               + 2 * DIM * 4),
        )

        kernel = functools.partial(
            cross_attention_kernel,
            heads=heads, dim_head=dim_head, eps=eps,
            compute_dtype=compute_dtype, exp_in_bf16=exp_in_bf16)

        out = pl.pallas_call(
            kernel,
            out_shape=jax.ShapeDtypeStruct((B, N, DIM), out_dtype),
            grid_spec=pltpu.PrefetchScalarGridSpec(
                num_scalar_prefetch=0,
                grid=(B, n_blocks, m_blocks),
                in_specs=[
                    pl.BlockSpec((1, block_n, DIM), lambda b, n, m: (b, n, 0)),
                    pl.BlockSpec((1, block_m, dim_head), lambda b, n, m: (b, m, 0)),
                    pl.BlockSpec((1, block_m, dim_head), lambda b, n, m: (b, m, 0)),
                    const_spec((1, DIM), lambda b, n, m: (0, 0)),
                    const_spec((1, DIM), lambda b, n, m: (0, 0)),
                    const_spec((DIM, inner), lambda b, n, m: (0, 0)),
                    const_spec((inner, DIM), lambda b, n, m: (0, 0)),
                ],
                out_specs=pl.BlockSpec((1, block_n, DIM), lambda b, n, m: (b, n, 0)),
                scratch_shapes=[
                    pltpu.VMEM((heads * block_n, dim_head), compute_dtype),  # q
                    pltpu.VMEM((heads * block_n, 1), jnp.float32),           # m
                    pltpu.VMEM((heads * block_n, 1), jnp.float32),           # l
                    pltpu.VMEM((heads * block_n, dim_head), jnp.float32),    # acc
                ],
            ),
            compiler_params=pltpu.CompilerParams(
                dimension_semantics=("parallel", "parallel", "arbitrary"),
                vmem_limit_bytes=vmem_limit,
            ),
            cost_estimate=cost,
        )(x, k, v, gamma2, beta2, wq_flat, wout_flat)
        return jax.block_until_ready(out)

    try:
        return _run(True)
    except Exception:
        # Fallback: default (double-buffered) weight pipelining.
        return _run(False)


def cross_attention_reference(x, context, params, *, heads, dim_head, eps=1e-5):
    """Pure-JAX (f32) reference mirroring the PyTorch forward."""
    gamma, beta, wq, wkv, wout = params
    scale = dim_head ** -0.5
    mean = jnp.mean(x, axis=-1, keepdims=True)
    var = jnp.mean((x - mean) ** 2, axis=-1, keepdims=True)
    xn = (x - mean) * jax.lax.rsqrt(var + eps) * gamma + beta
    q = xn @ wq                                                     # (B,N,inner)
    B, N, _ = q.shape
    q = q.reshape(B, N, heads, dim_head).transpose(0, 2, 1, 3) * scale  # (B,H,N,DH)
    kv = context @ wkv                                              # (B,M,2*DH)
    k, v = kv[..., :dim_head], kv[..., dim_head:]
    sim = jnp.einsum("bhid,bjd->bhij", q, k)
    sim = sim - jnp.max(sim, axis=-1, keepdims=True)
    attn = jax.nn.softmax(sim, axis=-1)
    out = jnp.einsum("bhij,bjd->bhid", attn, v)
    out = out.transpose(0, 2, 1, 3).reshape(B, N, heads * dim_head)
    return out @ wout


if __name__ == "__main__":
    # Small shapes consistent with the module.
    B, N, M = 2, 16, 8
    DIM, CDIM = 32, 32
    HEADS, DIM_HEAD = 4, 32
    INNER = HEADS * DIM_HEAD

    key = jax.random.PRNGKey(0)
    kx, kc, kq, kkv, ko = jax.random.split(key, 5)

    x = jax.random.normal(kx, (B, N, DIM), dtype=jnp.float32)
    context = jax.random.normal(kc, (B, M, CDIM), dtype=jnp.float32)

    # Deterministic parameter init (LayerNorm: ones/zeros; Linears: small normals).
    gamma = jnp.ones((DIM,), jnp.float32)
    beta = jnp.zeros((DIM,), jnp.float32)
    wq = jax.random.normal(kq, (DIM, INNER), dtype=jnp.float32) * 0.05
    wkv = jax.random.normal(kkv, (CDIM, 2 * DIM_HEAD), dtype=jnp.float32) * 0.05
    wout = jax.random.normal(ko, (INNER, DIM), dtype=jnp.float32) * 0.05
    params = (gamma, beta, wq, wkv, wout)

    out = cross_attention(x, context, params, heads=HEADS, dim_head=DIM_HEAD)
    out = jax.block_until_ready(out)

    ref = cross_attention_reference(x, context, params, heads=HEADS, dim_head=DIM_HEAD)
    assert out.shape == (B, N, DIM)
    # bf16 MXU inputs + approx reciprocal -> compare against the f32 reference
    # with a correspondingly relaxed tolerance.
    assert jnp.allclose(out, ref, atol=2e-2, rtol=2e-2), "mismatch vs reference"

    print("KERNEL_OK")
</pallas_src>

<mosaic_0001>
module attributes {stable_mosaic.version = 11 : i64} {
  func.func @kv_projection_kernel(%arg0: i32, %arg1: i32, %arg2: memref<1x8x32xbf16, #tpu.memory_space<vmem>>, %arg3: memref<32x64xbf16, #tpu.memory_space<vmem>>, %arg4: memref<1x8x32xbf16, #tpu.memory_space<vmem>>, %arg5: memref<1x8x32xbf16, #tpu.memory_space<vmem>>) attributes {dimension_semantics = [#tpu.dimension_semantics<parallel>, #tpu.dimension_semantics<parallel>], iteration_bounds = array<i64: 2, 1>, scalar_prefetch = 0 : i64, scratch_operands = 0 : i64, tpu.core_type = #tpu.core_type<tc>, window_params = [{transform_indices = @transform_0, window_bounds = array<i64: 1, 8, 32>}, {pipeline_mode = #tpu.pipeline_mode<synchronous>, transform_indices = @transform_1, window_bounds = array<i64: 32, 64>}, {transform_indices = @transform_2, window_bounds = array<i64: 1, 8, 32>}, {transform_indices = @transform_3, window_bounds = array<i64: 1, 8, 32>}]} {
    %c0 = arith.constant 0 : index
    %c0_0 = arith.constant 0 : index
    %c0_1 = arith.constant 0 : index
    %0 = vector.load %arg2[%c0, %c0_0, %c0_1] : memref<1x8x32xbf16, #tpu.memory_space<vmem>>, vector<1x8x32xbf16>
    %1 = vector.shape_cast %0 : vector<1x8x32xbf16> to vector<8x32xbf16>
    %c0_2 = arith.constant 0 : index
    %c0_3 = arith.constant 0 : index
    %2 = vector.load %arg3[%c0_2, %c0_3] : memref<32x64xbf16, #tpu.memory_space<vmem>>, vector<32x64xbf16>
    %cst = arith.constant dense<0.000000e+00> : vector<8x64xf32>
    %3 = tpu.matmul %1, %2, %cst {dimension_numbers = #tpu.dot_dimension_numbers<[1], [0], [0], [1], [0, 0, 1, 1], [], []>} : vector<8x32xbf16>, vector<32x64xbf16>, vector<8x64xf32> -> vector<8x64xf32>
    %4 = vector.extract_strided_slice %3 {offsets = [0, 0], sizes = [8, 32], strides = [1, 1]} : vector<8x64xf32> to vector<8x32xf32>
    %5 = arith.truncf %4 : vector<8x32xf32> to vector<8x32xbf16>
    %c0_4 = arith.constant 0 : index
    %c0_5 = arith.constant 0 : index
    %c0_6 = arith.constant 0 : index
    %6 = vector.load %arg4[%c0_4, %c0_5, %c0_6] : memref<1x8x32xbf16, #tpu.memory_space<vmem>>, vector<1x8x32xbf16>
    %7 = vector.shape_cast %6 : vector<1x8x32xbf16> to vector<8x32xbf16>
    %8 = vector.shape_cast %5 : vector<8x32xbf16> to vector<1x8x32xbf16>
    tpu.vector_store %arg4[%c0_4, %c0_5, %c0_6], %8 {strides = array<i32>} : memref<1x8x32xbf16, #tpu.memory_space<vmem>>, vector<1x8x32xbf16>,
    %9 = vector.extract_strided_slice %3 {offsets = [0, 32], sizes = [8, 32], strides = [1, 1]} : vector<8x64xf32> to vector<8x32xf32>
    %10 = arith.truncf %9 : vector<8x32xf32> to vector<8x32xbf16>
    %c0_7 = arith.constant 0 : index
    %c0_8 = arith.constant 0 : index
    %c0_9 = arith.constant 0 : index
    %11 = vector.load %arg5[%c0_7, %c0_8, %c0_9] : memref<1x8x32xbf16, #tpu.memory_space<vmem>>, vector<1x8x32xbf16>
    %12 = vector.shape_cast %11 : vector<1x8x32xbf16> to vector<8x32xbf16>
    %13 = vector.shape_cast %10 : vector<8x32xbf16> to vector<1x8x32xbf16>
    tpu.vector_store %arg5[%c0_7, %c0_8, %c0_9], %13 {strides = array<i32>} : memref<1x8x32xbf16, #tpu.memory_space<vmem>>, vector<1x8x32xbf16>,
    return
  }
  func.func @transform_0(%arg0: i32, %arg1: i32) -> (i32, i32, i32) {
    %c0_i32 = arith.constant 0 : i32
    %c0_i32_0 = arith.constant 0 : i32
    return %arg0, %arg1, %c0_i32 : i32, i32, i32
  }
  func.func @transform_1(%arg0: i32, %arg1: i32) -> (i32, i32) {
    %c0_i32 = arith.constant 0 : i32
    %c0_i32_0 = arith.constant 0 : i32
    %c0_i32_1 = arith.constant 0 : i32
    return %c0_i32, %c0_i32_0 : i32, i32
  }
  func.func @transform_2(%arg0: i32, %arg1: i32) -> (i32, i32, i32) {
    %c0_i32 = arith.constant 0 : i32
    %c0_i32_0 = arith.constant 0 : i32
    return %arg0, %arg1, %c0_i32 : i32, i32, i32
  }
  func.func @transform_3(%arg0: i32, %arg1: i32) -> (i32, i32, i32) {
    %c0_i32 = arith.constant 0 : i32
    %c0_i32_0 = arith.constant 0 : i32
    return %arg0, %arg1, %c0_i32 : i32, i32, i32
  }
}

module attributes {stable_mosaic.version = 11 : i64} {
  func.func @kv_projection_kernel(%arg0: i32, %arg1: i32, %arg2: memref<1x8x32xbf16, #tpu.memory_space<vmem>>, %arg3: memref<32x64xbf16, #tpu.memory_space<vmem>>, %arg4: memref<1x8x32xbf16, #tpu.memory_space<vmem>>, %arg5: memref<1x8x32xbf16, #tpu.memory_space<vmem>>) attributes {dimension_semantics = [#tpu.dimension_semantics<parallel>, #tpu.dimension_semantics<parallel>], iteration_bounds = array<i64: 2, 1>, scalar_prefetch = 0 : i64, scratch_operands = 0 : i64, tpu.core_type = #tpu.core_type<tc>, window_params = [{transform_indices = @transform_0, window_bounds = array<i64: 1, 8, 32>}, {pipeline_mode = #tpu.pipeline_mode<synchronous>, transform_indices = @transform_1, window_bounds = array<i64: 32, 64>}, {transform_indices = @transform_2, window_bounds = array<i64: 1, 8, 32>}, {transform_indices = @transform_3, window_bounds = array<i64: 1, 8, 32>}]} {
    %c0 = arith.constant 0 : index
    %c0_0 = arith.constant 0 : index
    %c0_1 = arith.constant 0 : index
    %0 = vector.load %arg2[%c0, %c0_0, %c0_1] : memref<1x8x32xbf16, #tpu.memory_space<vmem>>, vector<1x8x32xbf16>
    %1 = vector.shape_cast %0 : vector<1x8x32xbf16> to vector<8x32xbf16>
    %c0_2 = arith.constant 0 : index
    %c0_3 = arith.constant 0 : index
    %2 = vector.load %arg3[%c0_2, %c0_3] : memref<32x64xbf16, #tpu.memory_space<vmem>>, vector<32x64xbf16>
    %cst = arith.constant dense<0.000000e+00> : vector<8x64xf32>
    %3 = tpu.matmul %1, %2, %cst {dimension_numbers = #tpu.dot_dimension_numbers<[1], [0], [0], [1], [0, 0, 1, 1], [], []>} : vector<8x32xbf16>, vector<32x64xbf16>, vector<8x64xf32> -> vector<8x64xf32>
    %4 = vector.extract_strided_slice %3 {offsets = [0, 0], sizes = [8, 32], strides = [1, 1]} : vector<8x64xf32> to vector<8x32xf32>
    %5 = arith.truncf %4 : vector<8x32xf32> to vector<8x32xbf16>
    %c0_4 = arith.constant 0 : index
    %c0_5 = arith.constant 0 : index
    %c0_6 = arith.constant 0 : index
    %6 = vector.load %arg4[%c0_4, %c0_5, %c0_6] : memref<1x8x32xbf16, #tpu.memory_space<vmem>>, vector<1x8x32xbf16>
    %7 = vector.shape_cast %6 : vector<1x8x32xbf16> to vector<8x32xbf16>
    %8 = vector.shape_cast %5 : vector<8x32xbf16> to vector<1x8x32xbf16>
    tpu.vector_store %arg4[%c0_4, %c0_5, %c0_6], %8 {strides = array<i32>} : memref<1x8x32xbf16, #tpu.memory_space<vmem>>, vector<1x8x32xbf16>,
    %9 = vector.extract_strided_slice %3 {offsets = [0, 32], sizes = [8, 32], strides = [1, 1]} : vector<8x64xf32> to vector<8x32xf32>
    %10 = arith.truncf %9 : vector<8x32xf32> to vector<8x32xbf16>
    %c0_7 = arith.constant 0 : index
    %c0_8 = arith.constant 0 : index
    %c0_9 = arith.constant 0 : index
    %11 = vector.load %arg5[%c0_7, %c0_8, %c0_9] : memref<1x8x32xbf16, #tpu.memory_space<vmem>>, vector<1x8x32xbf16>
    %12 = vector.shape_cast %11 : vector<1x8x32xbf16> to vector<8x32xbf16>
    %13 = vector.shape_cast %10 : vector<8x32xbf16> to vector<1x8x32xbf16>
    tpu.vector_store %arg5[%c0_7, %c0_8, %c0_9], %13 {strides = array<i32>} : memref<1x8x32xbf16, #tpu.memory_space<vmem>>, vector<1x8x32xbf16>,
    return
  }
  func.func @transform_0(%arg0: i32, %arg1: i32) -> (i32, i32, i32) {
    %c0_i32 = arith.constant 0 : i32
    %c0_i32_0 = arith.constant 0 : i32
    return %arg0, %arg1, %c0_i32 : i32, i32, i32
  }
  func.func @transform_1(%arg0: i32, %arg1: i32) -> (i32, i32) {
    %c0_i32 = arith.constant 0 : i32
    %c0_i32_0 = arith.constant 0 : i32
    %c0_i32_1 = arith.constant 0 : i32
    return %c0_i32, %c0_i32_0 : i32, i32
  }
  func.func @transform_2(%arg0: i32, %arg1: i32) -> (i32, i32, i32) {
    %c0_i32 = arith.constant 0 : i32
    %c0_i32_0 = arith.constant 0 : i32
    return %arg0, %arg1, %c0_i32 : i32, i32, i32
  }
  func.func @transform_3(%arg0: i32, %arg1: i32) -> (i32, i32, i32) {
    %c0_i32 = arith.constant 0 : i32
    %c0_i32_0 = arith.constant 0 : i32
    return %arg0, %arg1, %c0_i32 : i32, i32, i32
  }
}

</mosaic_0001>

<bundles_post_ra>
// kernel: tpu_custom_call.1
= control target key start
LH: loop header
LB: loop body
LE: loop exit
PB: predicated region body
PF: predicated region fallthrough
CT: control target
= control target key end

     0   :  { %9 = vsyncpa [#allocation3], 0  ;;  %s1040_s0 = inlined_call_operand.hbm [shape: bf16[2,8,32], index: 0, kind: input, shape index: {}]   ;;  %s1041_s1 = inlined_call_operand.hbm [shape: bf16[32,64], index: 1, kind: input, shape index: {}]   ;;  %s1042_s2 = inlined_call_operand.hbm [shape: bf16[2,8,32], index: 2, kind: output, shape index: {0}]   ;;  %s1043_s3 = inlined_call_operand.hbm [shape: bf16[2,8,32], index: 3, kind: output, shape index: {1}]  }
   0x1   :  { %11 = vsyncpa [#allocation3 + $0x1], 0 }
   0x2   :  { %12 = vsyncpa [#allocation6], 0 }
   0x3   :  { %13 = vsyncpa [#allocation4], 0 }
   0x4   :  { %15 = vsyncpa [#allocation4 + $0x1], 0 }
   0x5   :  { %16 = vsyncpa [#allocation9], 0 }
   0x6   :  { %18 = vsyncpa [#allocation9 + $0x1], 0  ;;  %s786_s12 = smov 0   ;;  %s788_s13 = smov 0  }
   0x7   :  { %s790_s14 = smov 0   ;;  %s792_s15 = smov 0  }
   0x8   :  { %s794_s16 = smov 0   ;;  %s796_s17 = smov 0  }
   0x9 LB: > { %s460_s18 = sadd.s32 4294967295, %s755_s17   ;;  %s461_s19 = sadd.s32 4294967294, %s755_s17   ;;  %s755_s17 = sphi %s796_s17, %s24_s17   ;;  %s751_s16 = sphi %s794_s16, %s1067_s16   ;;  %s747_s15 = sphi %s792_s15, %s1066_s15   ;;  %s743_s14 = sphi %s790_s14, %s1065_s14   ;;  %s739_s13 = sphi %s788_s13, %s1064_s13   ;;  %s735_s12 = sphi %s786_s12, %s1063_s12  }
   0xa   : > { %p58_p0 = scmp.ne.s32.totalorder %s739_s13, %s735_s12  ;;  %p820_p1 = scmp.eq.s32.totalorder %s460_s18, 0 }
   0xb   : > { %p824_p2 = scmp.eq.s32.totalorder %s460_s18, 1  ;;  %p111_p3 = scmp.eq.s32.totalorder %s461_s19, 1 }
   0xc   : > { %s1048_s20 = scalar_select %p820_p1, 1, 0 }
   0xd   : > { %s1049_s21 = scalar_select %p824_p2, 1, 0 }
   0xe   : > { %p830_p4 = por %p820_p1, %p58_p0  ;;  %p462_p5 = scmp.ge.s32.totalorder %s755_s17, 1 }
   0xf   : > { %p835_p6 = por %p111_p3, %p58_p0  ;;  %p146_p7 = scmp.lt.s32.totalorder %s755_s17, 3 }
  0x10   : > { %s1050_s22 = scalar_select %p830_p4, 1, 0 }
  0x11   : > { %s1051_s23 = scalar_select %p835_p6, 1, 0 }
  0x12   : > { %p840_p8 = pnand %p462_p5, %p146_p7  ;;  %s757_s25 = smov [#allocation5]  }
  0x13   : > { %s158_s26 = sshll.u32 %s757_s25, 4  ;;  %s36_s28 = sadd.s32 1, %s751_s16  ;;  %s159_s26 = int_to_ptr.vmem [resolvable:$true] %s158_s26 }
  0x14   : > { %s1052_s24 = scalar_select %p840_p8, 1, 0 }
  0x15   : > { %p504_p9 = pneg %p840_p8  ;;  %s579_s4 = scalar_lea.hbm %s1041_s1, 256 }
  0x16   : > { %p580_p12 = scmp.ne.s32.totalorder %s1041_s1, %s579_s4  ;;  %p586_p5 = scmp.lt.u32.totalorder %s579_s4, %s1041_s1 }
  0x17   : > { %p849_p11 = pnand %p504_p9, %p820_p1 }
  0x19   : > { %p581_p13 = pneg %p849_p11 }
  0x1b   : > { %p582_p0 = pnand %p581_p13, %p580_p12 }
  0x1d   : > { %p583_p3 = pneg %p582_p0 }
  0x1f   : > { %p588_p7 = pnand %p586_p5, %p583_p3 }
  0x21   : > { %591 = shalt.err (!%p588_p7)
}
  0x22   : > { %s592_s9 = scalar_lea.vmem %s159_s26, 256  ;;  %p600_p1 = scmp.lt.s32.totalorder %s159_s26, %s159_s26 }
  0x23   : > { %p593_p9 = scmp.ne.s32.totalorder %s159_s26, %s592_s9  ;;  %p601_p4 = scmp.lt.s32.totalorder %s592_s9, %s592_s9 }
  0x25   : > { %p595_p10 = pnand %p593_p9, %p581_p13  ;;  %p602_p8 = por %p601_p4, %p600_p1 }
  0x27   : > { %p596_p6 = pneg %p595_p10 }
  0x29   : > { %p603_p2 = pnand %p602_p8, %p596_p6 }
  0x2b   : > { %606 = shalt.err (!%p603_p2)
}
  0x2c   : > { %s758_s10 = smov 64   ;;  %s759_s11 = smov 4  }
  0x2d   : > { %507 = dma.hbm_to_vmem [thread:$0]  (!%p849_p11), %s1041_s1, 256, %s159_s26, [#allocation6], %s758_s10, %s758_s10, %s759_s11  }
  0x2e   : > { %p38_p1 = scmp.ge.s32.totalorder %s36_s28, 2  ;;  %s45_s25 = sadd.s32 1, %s743_s14 }
  0x2f   : > { %p52_p2 = scmp.ne.s32.totalorder %s743_s14, %s739_s13  ;;  %p53_p4 = scmp.eq.s32.totalorder %s755_s17, 0 }
  0x30   : > { %s1069_s28 = smov (%p38_p1, %s36_s28), 0  ;;  %p1055_p8 = scmp.ne.s32.totalorder %s1049_s21, 0 }
  0x31   : > { %p876_p6 = por %p53_p4, %p52_p2  ;;  %s40_s27 = ssub.s32 %s751_s16, %s1069_s28 }
  0x32   : > { %p882_p10 = por %p1055_p8, %p52_p2  ;;  %p520_p12 = scmp.lt.s32.totalorder %s755_s17, 2 }
  0x33   : > { %p43_p11 = scmp.eq.s32.totalorder %s40_s27, 0  ;;  %s172_s26 = sand.u32 1, %s743_s14  }
  0x34   : > { %s465_s4 = sshll.u32 %s172_s26, 2  ;;  %s466_s6 = sshll.u32 %s751_s16, 6 }
  0x35   : > { %s891_s5 = scalar_select %p43_p11, %s743_s14, %s45_s25  }
  0x36   : > { %s897_s9 = scalar_lea.hbm %s1040_s0, %s466_s6  ;;  %s176_s21 = scalar_lea.vmem [#allocation2], %s465_s4 }
  0x37   : > { %s184_s10 = sshll.u32 %s176_s21, 4  ;;  %p903_p13 = pnand %p520_p12, %p876_p6  ;;  %s899_s10 = int_to_ptr.vmem [resolvable:$true] %s184_s10 }
  0x38   : > { %s173_s18 = scalar_lea.sflag [#allocation3], %s172_s26  ;;  %s607_s19 = scalar_lea.hbm %s897_s9, 64 }
  0x39   : > { %p608_p0 = scmp.ne.s32.totalorder %s897_s9, %s607_s19  ;;  %p609_p3 = pneg %p903_p13 }
  0x3a   : > { %s612_s4 = scalar_lea.hbm %s1040_s0, 128  ;;  %p613_p9 = scmp.lt.u32.totalorder %s897_s9, %s1040_s0 }
  0x3b   : > { %p610_p5 = pnand %p609_p3, %p608_p0  ;;  %p614_p1 = scmp.lt.u32.totalorder %s612_s4, %s607_s19 }
  0x3c   : > { %p616_p4 = scmp.lt.u32.totalorder %s607_s19, %s897_s9 }
  0x3d   : > { %p611_p7 = pneg %p610_p5  ;;  %p615_p2 = por %p614_p1, %p613_p9 }
  0x3f   : > { %p617_p6 = por %p616_p4, %p615_p2 }
  0x41   : > { %p618_p8 = pnand %p617_p6, %p611_p7 }
  0x43   : > { %621 = shalt.err (!%p618_p8)
}
  0x44   : > { %s622_s26 = scalar_lea.vmem %s899_s10, 64  ;;  %s760_s7 = smov [#allocation2]  }
  0x45   : > { %p623_p12 = scmp.ne.s32.totalorder %s899_s10, %s622_s26  ;;  %s627_s8 = sshll.u32 %s760_s7, 4  ;;  %s628_s8 = int_to_ptr.vmem [resolvable:$false] %s627_s8 }
  0x46   : > { %s629_s21 = scalar_lea.vmem %s628_s8, 128  ;;  %p630_p5 = scmp.lt.s32.totalorder %s899_s10, %s628_s8 }
  0x47   : > { %p625_p11 = pnand %p623_p12, %p609_p3  ;;  %p631_p9 = scmp.lt.s32.totalorder %s629_s21, %s622_s26 }
  0x49   : > { %p626_p0 = pneg %p625_p11  ;;  %p632_p1 = por %p631_p9, %p630_p5 }
  0x4b   : > { %p633_p2 = pnand %p632_p1, %p626_p0 }
  0x4d   : > { %636 = shalt.err (!%p633_p2)
}
  0x4e   : > { %511 = dma.hbm_to_vmem [thread:$0]  (!%p903_p13), %s897_s9, 64, %s899_s10, %s173_s18  }
  0x4f   : > { %p1058_p7 = scmp.ne.s32.totalorder %s1052_s24, 0 }
  0x50   : > { %s935_s19 = sand.u32 (!%p1058_p7), 1, %s739_s13   ;;  %p1059_p3 = scmp.ne.s32.totalorder (!%p1058_p7), %s1050_s22, 0 }
  0x51   : > { %193 = sbr.rel (%p1058_p7) target bundleno = 444 (0x1bc), region = 28  ;;  %s938_s25 = sshll.u32 (!%p1058_p7), %s935_s19, 2 }
  0x52   : > { %s196_s27 = scalar_lea.sflag (!%p1058_p7), [#allocation3], %s935_s19  ;;  %s199_s4 = scalar_lea.vmem (!%p1058_p7), [#allocation2], %s938_s25 }
  0x58   : > { %718 = dma.done.wait (%p1059_p3), %s196_s27, 64  }
  0x59   : > { %720 = vsyncadd (%p1059_p3), %s196_s27, 4294967232  ;;  %p1060_p13 = scmp.ne.s32.totalorder %s1048_s20, 0 }
  0x5b   : > { %722 = dma.done.wait (%p1060_p13), [#allocation6], 256  }
  0x5c   : > { %724 = vsyncadd (%p1060_p13), [#allocation6], 4294967040  ;;  %v761_v0 = vmov 0.0   ;;  %vm762_vm0 = vmmov 0   ;;  %v577_v1 = vld [vmem:[#allocation5] sm:$0xff]   ;;  %v578_v2 = vld [vmem:[#allocation5 + $0x8] sm:$0xff]  }
  0x5d   : > { %486 = vmatprep.subr.bf16.mxu0 %v761_v0  ;;  %490 = vmatprep.mubr.msk.bf16.mxu0 %vm762_vm0, %v761_v0  ;;  %v232_v3 = vld [vmem:[%s199_s4] sm:$0xf]  ;;  %vm249_vm1 = vcmask 261120   ;;  %s478_s22 = sshll.u32 %s747_s15, 6  ;;  %s223_s24 = scalar_lea.vmem [#allocation7], %s938_s25  ;;  %vm294_vm2 = vcmask 257024  }
  0x5e   : > { %487 = vmatpush3.bf16.msra.mxu0 %v577_v1  ;;  %s323_s20 = sshll.u32 %s223_s24, 4  ;;  %s957_s11 = scalar_lea.hbm %s1042_s2, %s478_s22  ;;  %s959_s20 = int_to_ptr.vmem [resolvable:$true] %s323_s20 }
  0x5f   : > { %488 = vmatprep.subr.bf16.mxu0 %v761_v0  ;;  %s763_s18 = smov 96   ;;  %s304_s29 = scalar_lea.sflag [#allocation4], %s935_s19 }
  0x60   : > { %s637_s6 = scalar_lea.vmem %s959_s20, 64  ;;  %s764_s26 = smov [#allocation7]  }
  0x61   : > { %p638_p4 = scmp.ne.s32.totalorder %s959_s20, %s637_s6  ;;  %s641_s7 = sshll.u32 %s764_s26, 4  ;;  %s642_s7 = int_to_ptr.vmem [resolvable:$false] %s641_s7 }
  0x62   : > { %489 = vmatpush3.bf16.msra.mxu0 %v578_v2  ;;  %s643_s8 = scalar_lea.vmem %s642_s7, 128  ;;  %p644_p12 = scmp.lt.s32.totalorder %s959_s20, %s642_s7 }
  0x63   : > { %p639_p6 = pnand %p638_p4, %p882_p10  ;;  %p645_p11 = scmp.lt.s32.totalorder %s643_s8, %s637_s6 }
  0x65   : > { %491 = vmatmul.mubr.msk.bf16.vlgmr.msra.gmra.mrb[0].mxu0 %vm249_vm1, %v232_v3  ;;  %p640_p8 = pneg %p639_p6  ;;  %p646_p0 = por %p645_p11, %p644_p12 }
  0x67   : > { %p647_p5 = pnand %p646_p0, %p640_p8 }
 0x138   : > { %v287_v4 = vpop.f32.mrb[0].mxu0 }
 0x139   : > { %v293_v5 = vpack.c.bf16 %v287_v4, %v287_v4  ;;  %v492_v6 = vpop.f32.mrb[1].mxu0 }
 0x13a   : > { %v290_v7 = vpop.f32.mrb[2].mxu0 }
 0x13b   : > { %v493_v8 = vpop.f32.mrb[3].mxu0  ;;  %299 = vrot.lane.b32.xlu0 %v293_v5, %s763_s18  ;;  %295 = vst.msk [vmem:[%s223_s24] sm:$0xf] %vm294_vm2, %v293_v5 }
 0x13c   : > { %650 = shalt.err (!%p647_p5)
}
 0x13d   : > { %s651_s21 = scalar_lea.hbm %s957_s11, 64  ;;  %s655_s24 = scalar_lea.hbm %s1042_s2, 128 }
 0x13e   : > { %p652_p9 = scmp.ne.s32.totalorder %s957_s11, %s651_s21  ;;  %p656_p7 = scmp.lt.u32.totalorder %s957_s11, %s1042_s2 }
 0x13f   : > { %p657_p3 = scmp.lt.u32.totalorder %s655_s24, %s651_s21  ;;  %p659_p4 = scmp.lt.u32.totalorder %s651_s21, %s957_s11 }
 0x140   : > { %p653_p1 = pnand %p652_p9, %p882_p10 }
 0x141   : > { %p658_p13 = por %p657_p3, %p656_p7 }
 0x142   : > { %p654_p2 = pneg %p653_p1 }
 0x143   : > { %p660_p6 = por %p659_p4, %p658_p13 }
 0x145   : > { %p661_p8 = pnand %p660_p6, %p654_p2 }
 0x147   : > { %664 = shalt.err (!%p661_p8)
}
 0x148   : > { %500 = dma.vmem_to_hbm [thread:$0]  (%p882_p10), %s959_s20, 64, %s957_s11, %s304_s29  }
 0x149   : > { %s230_s18 = scalar_lea.vmem [#allocation8], %s938_s25  ;;  %s990_s8 = scalar_lea.hbm %s1043_s3, %s478_s22 }
 0x14a   : > { %s337_s6 = sshll.u32 %s230_s18, 4  ;;  %s309_s21 = scalar_lea.sflag [#allocation9], %s935_s19  ;;  %s992_s6 = int_to_ptr.vmem [resolvable:$true] %s337_s6 }
 0x14b   : > { %s665_s27 = scalar_lea.vmem %s992_s6, 64  ;;  %s765_s15 = smov [#allocation8]  }
 0x14c   : > { %p666_p12 = scmp.ne.s32.totalorder %s992_s6, %s665_s27  ;;  %s669_s25 = sshll.u32 %s765_s15, 4  ;;  %s670_s25 = int_to_ptr.vmem [resolvable:$false] %s669_s25 }
 0x14d   : > { %s671_s20 = scalar_lea.vmem %s670_s25, 128  ;;  %p672_p5 = scmp.lt.s32.totalorder %s992_s6, %s670_s25 }
 0x14e   : > { %p667_p11 = pnand %p666_p12, %p882_p10  ;;  %p673_p9 = scmp.lt.s32.totalorder %s671_s20, %s665_s27 }
 0x150   : > { %p668_p0 = pneg %p667_p11  ;;  %p674_p1 = por %p673_p9, %p672_p5 }
 0x152   : > { %p675_p2 = pnand %p674_p1, %p668_p0 }
 0x1ad   : > { %v300_v9 = vpop.permute.xlu0 %299 }
 0x1ae   : > { %302 = vst.msk [vmem:[%s230_s18] sm:$0xf] %vm294_vm2, %v300_v9 }
 0x1af   : > { %678 = shalt.err (!%p675_p2)
}
 0x1b0   : > { %s679_s19 = scalar_lea.hbm %s990_s8, 64  ;;  %s683_s29 = scalar_lea.hbm %s1043_s3, 128 }
 0x1b1   : > { %p680_p7 = scmp.ne.s32.totalorder %s990_s8, %s679_s19  ;;  %p684_p4 = scmp.lt.u32.totalorder %s990_s8, %s1043_s3 }
 0x1b2   : > { %p685_p6 = scmp.lt.u32.totalorder %s683_s29, %s679_s19  ;;  %p687_p12 = scmp.lt.u32.totalorder %s679_s19, %s990_s8 }
 0x1b3   : > { %p681_p3 = pnand %p680_p7, %p882_p10 }
 0x1b4   : > { %p686_p8 = por %p685_p6, %p684_p4 }
 0x1b5   : > { %p682_p13 = pneg %p681_p3 }
 0x1b6   : > { %p688_p11 = por %p687_p12, %p686_p8 }
 0x1b8   : > { %p689_p0 = pnand %p688_p11, %p682_p13 }
 0x1ba   : > { %692 = shalt.err (!%p689_p0)
}
 0x1bb   : > { %501 = dma.vmem_to_hbm [thread:$0]  (%p882_p10), %s992_s6, 64, %s990_s8, %s309_s21  }
 0x1bc PF: > { %s349_s9 = sand.u32 1, %s735_s12   ;;  %p1061_p5 = scmp.ne.s32.totalorder %s1051_s23, 0 }
 0x1bd   : > { %p1062_p9 = scmp.ge.s32.totalorder %s755_s17, 2  ;;  %s350_s10 = scalar_lea.sflag [#allocation4], %s349_s9 }
 0x1bf   : > { %p513_p1 = pnand %p1062_p9, %p1061_p5 }
 0x1c1   : > { %726 = dma.done.wait (!%p513_p1), %s350_s10, 64  }
 0x1c2   : > { %728 = vsyncadd (!%p513_p1), %s350_s10, 4294967232  ;;  %s359_s18 = scalar_lea.sflag [#allocation9], %s349_s9 }
 0x1c3   : > { %730 = dma.done.wait (!%p513_p1), %s359_s18, 64  }
 0x1c4   : > { %732 = vsyncadd (!%p513_p1), %s359_s18, 4294967232  ;;  %s24_s17 = sadd.s32 1, %s755_s17   ;;  %s1063_s12 = smov %s739_s13 }
 0x1c5   : > { %p21_p2 = scmp.ge.s32.totalorder %s24_s17, 4   ;;  %s1064_s13 = smov %s743_s14 }
 0x1c6   : > { %s1065_s14 = smov %s891_s5  ;;  %s1066_s15 = smov %s751_s16 }
 0x1c7   : > { %s1067_s16 = smov %s1069_s28  ;;  %23 = sbr.rel (!%p21_p2) target bundleno = 9 (0x9), region = 94 }
 0x1ce   :  { %364 = vsyncpa [#allocation3], 1 }
 0x1cf   :  { %366 = vsyncpa [#allocation3 + $0x1], 1 }
 0x1d0   :  { %367 = vsyncpa [#allocation6], 1 }
 0x1d1   :  { %368 = vsyncpa [#allocation4], 1 }
 0x1d2   :  { %370 = vsyncpa [#allocation4 + $0x1], 1 }
 0x1d3   :  { %371 = vsyncpa [#allocation9], 1 }
 0x1d4   :  { %373 = vsyncpa [#allocation9 + $0x1], 1 }

// kernel: tpu_custom_call.1
= control target key start
LH: loop header
LB: loop body
LE: loop exit
PB: predicated region body
PF: predicated region fallthrough
CT: control target
= control target key end

     0   :  { %9 = vsyncpa [#allocation3], 0  ;;  %s1040_s0 = inlined_call_operand.hbm [shape: bf16[2,8,32], index: 0, kind: input, shape index: {}]   ;;  %s1041_s1 = inlined_call_operand.hbm [shape: bf16[32,64], index: 1, kind: input, shape index: {}]   ;;  %s1042_s2 = inlined_call_operand.hbm [shape: bf16[2,8,32], index: 2, kind: output, shape index: {0}]   ;;  %s1043_s3 = inlined_call_operand.hbm [shape: bf16[2,8,32], index: 3, kind: output, shape index: {1}]  }
   0x1   :  { %11 = vsyncpa [#allocation3 + $0x1], 0 }
   0x2   :  { %12 = vsyncpa [#allocation6], 0 }
   0x3   :  { %13 = vsyncpa [#allocation4], 0 }
   0x4   :  { %15 = vsyncpa [#allocation4 + $0x1], 0 }
   0x5   :  { %16 = vsyncpa [#allocation9], 0 }
   0x6   :  { %18 = vsyncpa [#allocation9 + $0x1], 0  ;;  %s786_s12 = smov 0   ;;  %s788_s13 = smov 0  }
   0x7   :  { %s790_s14 = smov 0   ;;  %s792_s15 = smov 0  }
   0x8   :  { %s794_s16 = smov 0   ;;  %s796_s17 = smov 0  }
   0x9 LB: > { %s460_s18 = sadd.s32 4294967295, %s755_s17   ;;  %s461_s19 = sadd.s32 4294967294, %s755_s17   ;;  %s755_s17 = sphi %s796_s17, %s24_s17   ;;  %s751_s16 = sphi %s794_s16, %s1067_s16   ;;  %s747_s15 = sphi %s792_s15, %s1066_s15   ;;  %s743_s14 = sphi %s790_s14, %s1065_s14   ;;  %s739_s13 = sphi %s788_s13, %s1064_s13   ;;  %s735_s12 = sphi %s786_s12, %s1063_s12  }
   0xa   : > { %p58_p0 = scmp.ne.s32.totalorder %s739_s13, %s735_s12  ;;  %p820_p1 = scmp.eq.s32.totalorder %s460_s18, 0 }
   0xb   : > { %p824_p2 = scmp.eq.s32.totalorder %s460_s18, 1  ;;  %p111_p3 = scmp.eq.s32.totalorder %s461_s19, 1 }
   0xc   : > { %s1048_s20 = scalar_select %p820_p1, 1, 0 }
   0xd   : > { %s1049_s21 = scalar_select %p824_p2, 1, 0 }
   0xe   : > { %p830_p4 = por %p820_p1, %p58_p0  ;;  %p462_p5 = scmp.ge.s32.totalorder %s755_s17, 1 }
   0xf   : > { %p835_p6 = por %p111_p3, %p58_p0  ;;  %p146_p7 = scmp.lt.s32.totalorder %s755_s17, 3 }
  0x10   : > { %s1050_s22 = scalar_select %p830_p4, 1, 0 }
  0x11   : > { %s1051_s23 = scalar_select %p835_p6, 1, 0 }
  0x12   : > { %p840_p8 = pnand %p462_p5, %p146_p7  ;;  %s757_s25 = smov [#allocation5]  }
  0x13   : > { %s158_s26 = sshll.u32 %s757_s25, 4  ;;  %s36_s28 = sadd.s32 1, %s751_s16  ;;  %s159_s26 = int_to_ptr.vmem [resolvable:$true] %s158_s26 }
  0x14   : > { %s1052_s24 = scalar_select %p840_p8, 1, 0 }
  0x15   : > { %p504_p9 = pneg %p840_p8  ;;  %s579_s4 = scalar_lea.hbm %s1041_s1, 256 }
  0x16   : > { %p580_p12 = scmp.ne.s32.totalorder %s1041_s1, %s579_s4  ;;  %p586_p5 = scmp.lt.u32.totalorder %s579_s4, %s1041_s1 }
  0x17   : > { %p849_p11 = pnand %p504_p9, %p820_p1 }
  0x19   : > { %p581_p13 = pneg %p849_p11 }
  0x1b   : > { %p582_p0 = pnand %p581_p13, %p580_p12 }
  0x1d   : > { %p583_p3 = pneg %p582_p0 }
  0x1f   : > { %p588_p7 = pnand %p586_p5, %p583_p3 }
  0x21   : > { %591 = shalt.err (!%p588_p7)
}
  0x22   : > { %s592_s9 = scalar_lea.vmem %s159_s26, 256  ;;  %p600_p1 = scmp.lt.s32.totalorder %s159_s26, %s159_s26 }
  0x23   : > { %p593_p9 = scmp.ne.s32.totalorder %s159_s26, %s592_s9  ;;  %p601_p4 = scmp.lt.s32.totalorder %s592_s9, %s592_s9 }
  0x25   : > { %p595_p10 = pnand %p593_p9, %p581_p13  ;;  %p602_p8 = por %p601_p4, %p600_p1 }
  0x27   : > { %p596_p6 = pneg %p595_p10 }
  0x29   : > { %p603_p2 = pnand %p602_p8, %p596_p6 }
  0x2b   : > { %606 = shalt.err (!%p603_p2)
}
  0x2c   : > { %s758_s10 = smov 64   ;;  %s759_s11 = smov 4  }
  0x2d   : > { %507 = dma.hbm_to_vmem [thread:$0]  (!%p849_p11), %s1041_s1, 256, %s159_s26, [#allocation6], %s758_s10, %s758_s10, %s759_s11  }
  0x2e   : > { %p38_p1 = scmp.ge.s32.totalorder %s36_s28, 2  ;;  %s45_s25 = sadd.s32 1, %s743_s14 }
  0x2f   : > { %p52_p2 = scmp.ne.s32.totalorder %s743_s14, %s739_s13  ;;  %p53_p4 = scmp.eq.s32.totalorder %s755_s17, 0 }
  0x30   : > { %s1069_s28 = smov (%p38_p1, %s36_s28), 0  ;;  %p1055_p8 = scmp.ne.s32.totalorder %s1049_s21, 0 }
  0x31   : > { %p876_p6 = por %p53_p4, %p52_p2  ;;  %s40_s27 = ssub.s32 %s751_s16, %s1069_s28 }
  0x32   : > { %p882_p10 = por %p1055_p8, %p52_p2  ;;  %p520_p12 = scmp.lt.s32.totalorder %s755_s17, 2 }
  0x33   : > { %p43_p11 = scmp.eq.s32.totalorder %s40_s27, 0  ;;  %s172_s26 = sand.u32 1, %s743_s14  }
  0x34   : > { %s465_s4 = sshll.u32 %s172_s26, 2  ;;  %s466_s6 = sshll.u32 %s751_s16, 6 }
  0x35   : > { %s891_s5 = scalar_select %p43_p11, %s743_s14, %s45_s25  }
  0x36   : > { %s897_s9 = scalar_lea.hbm %s1040_s0, %s466_s6  ;;  %s176_s21 = scalar_lea.vmem [#allocation2], %s465_s4 }
  0x37   : > { %s184_s10 = sshll.u32 %s176_s21, 4  ;;  %p903_p13 = pnand %p520_p12, %p876_p6  ;;  %s899_s10 = int_to_ptr.vmem [resolvable:$true] %s184_s10 }
  0x38   : > { %s173_s18 = scalar_lea.sflag [#allocation3], %s172_s26  ;;  %s607_s19 = scalar_lea.hbm %s897_s9, 64 }
  0x39   : > { %p608_p0 = scmp.ne.s32.totalorder %s897_s9, %s607_s19  ;;  %p609_p3 = pneg %p903_p13 }
  0x3a   : > { %s612_s4 = scalar_lea.hbm %s1040_s0, 128  ;;  %p613_p9 = scmp.lt.u32.totalorder %s897_s9, %s1040_s0 }
  0x3b   : > { %p610_p5 = pnand %p609_p3, %p608_p0  ;;  %p614_p1 = scmp.lt.u32.totalorder %s612_s4, %s607_s19 }
  0x3c   : > { %p616_p4 = scmp.lt.u32.totalorder %s607_s19, %s897_s9 }
  0x3d   : > { %p611_p7 = pneg %p610_p5  ;;  %p615_p2 = por %p614_p1, %p613_p9 }
  0x3f   : > { %p617_p6 = por %p616_p4, %p615_p2 }
  0x41   : > { %p618_p8 = pnand %p617_p6, %p611_p7 }
  0x43   : > { %621 = shalt.err (!%p618_p8)
}
  0x44   : > { %s622_s26 = scalar_lea.vmem %s899_s10, 64  ;;  %s760_s7 = smov [#allocation2]  }
  0x45   : > { %p623_p12 = scmp.ne.s32.totalorder %s899_s10, %s622_s26  ;;  %s627_s8 = sshll.u32 %s760_s7, 4  ;;  %s628_s8 = int_to_ptr.vmem [resolvable:$false] %s627_s8 }
  0x46   : > { %s629_s21 = scalar_lea.vmem %s628_s8, 128  ;;  %p630_p5 = scmp.lt.s32.totalorder %s899_s10, %s628_s8 }
  0x47   : > { %p625_p11 = pnand %p623_p12, %p609_p3  ;;  %p631_p9 = scmp.lt.s32.totalorder %s629_s21, %s622_s26 }
  0x49   : > { %p626_p0 = pneg %p625_p11  ;;  %p632_p1 = por %p631_p9, %p630_p5 }
  0x4b   : > { %p633_p2 = pnand %p632_p1, %p626_p0 }
  0x4d   : > { %636 = shalt.err (!%p633_p2)
}
  0x4e   : > { %511 = dma.hbm_to_vmem [thread:$0]  (!%p903_p13), %s897_s9, 64, %s899_s10, %s173_s18  }
  0x4f   : > { %p1058_p7 = scmp.ne.s32.totalorder %s1052_s24, 0 }
  0x50   : > { %s935_s19 = sand.u32 (!%p1058_p7), 1, %s739_s13   ;;  %p1059_p3 = scmp.ne.s32.totalorder (!%p1058_p7), %s1050_s22, 0 }
  0x51   : > { %193 = sbr.rel (%p1058_p7) target bundleno = 444 (0x1bc), region = 28  ;;  %s938_s25 = sshll.u32 (!%p1058_p7), %s935_s19, 2 }
  0x52   : > { %s196_s27 = scalar_lea.sflag (!%p1058_p7), [#allocation3], %s935_s19  ;;  %s199_s4 = scalar_lea.vmem (!%p1058_p7), [#allocation2], %s938_s25 }
  0x58   : > { %718 = dma.done.wait (%p1059_p3), %s196_s27, 64  }
  0x59   : > { %720 = vsyncadd (%p1059_p3), %s196_s27, 4294967232  ;;  %p1060_p13 = scmp.ne.s32.totalorder %s1048_s20, 0 }
  0x5b   : > { %722 = dma.done.wait (%p1060_p13), [#allocation6], 256  }
  0x5c   : > { %724 = vsyncadd (%p1060_p13), [#allocation6], 4294967040  ;;  %v761_v0 = vmov 0.0   ;;  %vm762_vm0 = vmmov 0   ;;  %v577_v1 = vld [vmem:[#allocation5] sm:$0xff]   ;;  %v578_v2 = vld [vmem:[#allocation5 + $0x8] sm:$0xff]  }
  0x5d   : > { %486 = vmatprep.subr.bf16.mxu0 %v761_v0  ;;  %490 = vmatprep.mubr.msk.bf16.mxu0 %vm762_vm0, %v761_v0  ;;  %v232_v3 = vld [vmem:[%s199_s4] sm:$0xf]  ;;  %vm249_vm1 = vcmask 261120   ;;  %s478_s22 = sshll.u32 %s747_s15, 6  ;;  %s223_s24 = scalar_lea.vmem [#allocation7], %s938_s25  ;;  %vm294_vm2 = vcmask 257024  }
  0x5e   : > { %487 = vmatpush3.bf16.msra.mxu0 %v577_v1  ;;  %s323_s20 = sshll.u32 %s223_s24, 4  ;;  %s957_s11 = scalar_lea.hbm %s1042_s2, %s478_s22  ;;  %s959_s20 = int_to_ptr.vmem [resolvable:$true] %s323_s20 }
  0x5f   : > { %488 = vmatprep.subr.bf16.mxu0 %v761_v0  ;;  %s763_s18 = smov 96   ;;  %s304_s29 = scalar_lea.sflag [#allocation4], %s935_s19 }
  0x60   : > { %s637_s6 = scalar_lea.vmem %s959_s20, 64  ;;  %s764_s26 = smov [#allocation7]  }
  0x61   : > { %p638_p4 = scmp.ne.s32.totalorder %s959_s20, %s637_s6  ;;  %s641_s7 = sshll.u32 %s764_s26, 4  ;;  %s642_s7 = int_to_ptr.vmem [resolvable:$false] %s641_s7 }
  0x62   : > { %489 = vmatpush3.bf16.msra.mxu0 %v578_v2  ;;  %s643_s8 = scalar_lea.vmem %s642_s7, 128  ;;  %p644_p12 = scmp.lt.s32.totalorder %s959_s20, %s642_s7 }
  0x63   : > { %p639_p6 = pnand %p638_p4, %p882_p10  ;;  %p645_p11 = scmp.lt.s32.totalorder %s643_s8, %s637_s6 }
  0x65   : > { %491 = vmatmul.mubr.msk.bf16.vlgmr.msra.gmra.mrb[0].mxu0 %vm249_vm1, %v232_v3  ;;  %p640_p8 = pneg %p639_p6  ;;  %p646_p0 = por %p645_p11, %p644_p12 }
  0x67   : > { %p647_p5 = pnand %p646_p0, %p640_p8 }
 0x138   : > { %v287_v4 = vpop.f32.mrb[0].mxu0 }
 0x139   : > { %v293_v5 = vpack.c.bf16 %v287_v4, %v287_v4  ;;  %v492_v6 = vpop.f32.mrb[1].mxu0 }
 0x13a   : > { %v290_v7 = vpop.f32.mrb[2].mxu0 }
 0x13b   : > { %v493_v8 = vpop.f32.mrb[3].mxu0  ;;  %299 = vrot.lane.b32.xlu0 %v293_v5, %s763_s18  ;;  %295 = vst.msk [vmem:[%s223_s24] sm:$0xf] %vm294_vm2, %v293_v5 }
 0x13c   : > { %650 = shalt.err (!%p647_p5)
}
 0x13d   : > { %s651_s21 = scalar_lea.hbm %s957_s11, 64  ;;  %s655_s24 = scalar_lea.hbm %s1042_s2, 128 }
 0x13e   : > { %p652_p9 = scmp.ne.s32.totalorder %s957_s11, %s651_s21  ;;  %p656_p7 = scmp.lt.u32.totalorder %s957_s11, %s1042_s2 }
 0x13f   : > { %p657_p3 = scmp.lt.u32.totalorder %s655_s24, %s651_s21  ;;  %p659_p4 = scmp.lt.u32.totalorder %s651_s21, %s957_s11 }
 0x140   : > { %p653_p1 = pnand %p652_p9, %p882_p10 }
 0x141   : > { %p658_p13 = por %p657_p3, %p656_p7 }
 0x142   : > { %p654_p2 = pneg %p653_p1 }
 0x143   : > { %p660_p6 = por %p659_p4, %p658_p13 }
 0x145   : > { %p661_p8 = pnand %p660_p6, %p654_p2 }
 0x147   : > { %664 = shalt.err (!%p661_p8)
}
 0x148   : > { %500 = dma.vmem_to_hbm [thread:$0]  (%p882_p10), %s959_s20, 64, %s957_s11, %s304_s29  }
 0x149   : > { %s230_s18 = scalar_lea.vmem [#allocation8], %s938_s25  ;;  %s990_s8 = scalar_lea.hbm %s1043_s3, %s478_s22 }
 0x14a   : > { %s337_s6 = sshll.u32 %s230_s18, 4  ;;  %s309_s21 = scalar_lea.sflag [#allocation9], %s935_s19  ;;  %s992_s6 = int_to_ptr.vmem [resolvable:$true] %s337_s6 }
 0x14b   : > { %s665_s27 = scalar_lea.vmem %s992_s6, 64  ;;  %s765_s15 = smov [#allocation8]  }
 0x14c   : > { %p666_p12 = scmp.ne.s32.totalorder %s992_s6, %s665_s27  ;;  %s669_s25 = sshll.u32 %s765_s15, 4  ;;  %s670_s25 = int_to_ptr.vmem [resolvable:$false] %s669_s25 }
 0x14d   : > { %s671_s20 = scalar_lea.vmem %s670_s25, 128  ;;  %p672_p5 = scmp.lt.s32.totalorder %s992_s6, %s670_s25 }
 0x14e   : > { %p667_p11 = pnand %p666_p12, %p882_p10  ;;  %p673_p9 = scmp.lt.s32.totalorder %s671_s20, %s665_s27 }
 0x150   : > { %p668_p0 = pneg %p667_p11  ;;  %p674_p1 = por %p673_p9, %p672_p5 }
 0x152   : > { %p675_p2 = pnand %p674_p1, %p668_p0 }
 0x1ad   : > { %v300_v9 = vpop.permute.xlu0 %299 }
 0x1ae   : > { %302 = vst.msk [vmem:[%s230_s18] sm:$0xf] %vm294_vm2, %v300_v9 }
 0x1af   : > { %678 = shalt.err (!%p675_p2)
}
 0x1b0   : > { %s679_s19 = scalar_lea.hbm %s990_s8, 64  ;;  %s683_s29 = scalar_lea.hbm %s1043_s3, 128 }
 0x1b1   : > { %p680_p7 = scmp.ne.s32.totalorder %s990_s8, %s679_s19  ;;  %p684_p4 = scmp.lt.u32.totalorder %s990_s8, %s1043_s3 }
 0x1b2   : > { %p685_p6 = scmp.lt.u32.totalorder %s683_s29, %s679_s19  ;;  %p687_p12 = scmp.lt.u32.totalorder %s679_s19, %s990_s8 }
 0x1b3   : > { %p681_p3 = pnand %p680_p7, %p882_p10 }
 0x1b4   : > { %p686_p8 = por %p685_p6, %p684_p4 }
 0x1b5   : > { %p682_p13 = pneg %p681_p3 }
 0x1b6   : > { %p688_p11 = por %p687_p12, %p686_p8 }
 0x1b8   : > { %p689_p0 = pnand %p688_p11, %p682_p13 }
 0x1ba   : > { %692 = shalt.err (!%p689_p0)
}
 0x1bb   : > { %501 = dma.vmem_to_hbm [thread:$0]  (%p882_p10), %s992_s6, 64, %s990_s8, %s309_s21  }
 0x1bc PF: > { %s349_s9 = sand.u32 1, %s735_s12   ;;  %p1061_p5 = scmp.ne.s32.totalorder %s1051_s23, 0 }
 0x1bd   : > { %p1062_p9 = scmp.ge.s32.totalorder %s755_s17, 2  ;;  %s350_s10 = scalar_lea.sflag [#allocation4], %s349_s9 }
 0x1bf   : > { %p513_p1 = pnand %p1062_p9, %p1061_p5 }
 0x1c1   : > { %726 = dma.done.wait (!%p513_p1), %s350_s10, 64  }
 0x1c2   : > { %728 = vsyncadd (!%p513_p1), %s350_s10, 4294967232  ;;  %s359_s18 = scalar_lea.sflag [#allocation9], %s349_s9 }
 0x1c3   : > { %730 = dma.done.wait (!%p513_p1), %s359_s18, 64  }
 0x1c4   : > { %732 = vsyncadd (!%p513_p1), %s359_s18, 4294967232  ;;  %s24_s17 = sadd.s32 1, %s755_s17   ;;  %s1063_s12 = smov %s739_s13 }
 0x1c5   : > { %p21_p2 = scmp.ge.s32.totalorder %s24_s17, 4   ;;  %s1064_s13 = smov %s743_s14 }
 0x1c6   : > { %s1065_s14 = smov %s891_s5  ;;  %s1066_s15 = smov %s751_s16 }
 0x1c7   : > { %s1067_s16 = smov %s1069_s28  ;;  %23 = sbr.rel (!%p21_p2) target bundleno = 9 (0x9), region = 94 }
 0x1ce   :  { %364 = vsyncpa [#allocation3], 1 }
 0x1cf   :  { %366 = vsyncpa [#allocation3 + $0x1], 1 }
 0x1d0   :  { %367 = vsyncpa [#allocation6], 1 }
 0x1d1   :  { %368 = vsyncpa [#allocation4], 1 }
 0x1d2   :  { %370 = vsyncpa [#allocation4 + $0x1], 1 }
 0x1d3   :  { %371 = vsyncpa [#allocation9], 1 }
 0x1d4   :  { %373 = vsyncpa [#allocation9 + $0x1], 1 }

</bundles_post_ra>
